<compile_context>
chip_gen: v7x
topology: tpu7x:2x2x1
jax: 0.10.0
libtpu: 0.0.40
codegen_flags: <defaults>
</compile_context>

<pallas_src>
import numpy as np
import jax
import jax.numpy as jnp
from jax.experimental import pallas as pl
from jax.experimental.pallas import tpu as pltpu

C1 = 32    # conv1 output channels
C2 = 64    # conv2 output channels
HID = 128  # FC hidden width


def _round_up(x, m):
    return (x + m - 1) // m * m


# -----------------------------------------------------------------------------
# Fused forward kernel: one batch tile (TB boards) per grid step.
# Every layer is a plain (TB, K) x (K, N) matmul: bf16 operands, f32 accumulate.
# -----------------------------------------------------------------------------
def _fused_forward_kernel(x_ref, w1_ref, s1_ref, b1_ref,
                          w2_ref, s2_ref, b2_ref,
                          wh1_ref, bh1_ref, wh2_ref, bh2_ref,
                          out_ref):
    f32, bf16 = jnp.float32, jnp.bfloat16

    # conv1 (as dense 27->288 map over NCHW-flattened boards) + folded BN + ReLU
    x = x_ref[...].astype(bf16)                                      # (TB, 27)
    h1 = jnp.dot(x, w1_ref[...], preferred_element_type=f32)         # (TB, 288)
    h1 = jnp.maximum(h1 * s1_ref[...] + b1_ref[...], 0.0)

    # conv2 (dense 288->576 map) + folded BN + ReLU
    h2 = jnp.dot(h1.astype(bf16), w2_ref[...], preferred_element_type=f32)
    h2 = jnp.maximum(h2 * s2_ref[...] + b2_ref[...], 0.0)            # (TB, 576)

    # policy/value FC1 fused along the output dim + ReLU
    hh = jnp.dot(h2.astype(bf16), wh1_ref[...], preferred_element_type=f32)
    hh = jnp.maximum(hh + bh1_ref[...], 0.0)                         # (TB, 256)

    # fused FC2 (block-diagonal weight) -> merged (TB, A+1) slab;
    # tanh applied only to the value column (last lane).
    comb = jnp.dot(hh.astype(bf16), wh2_ref[...], preferred_element_type=f32)
    comb = comb + bh2_ref[...]                                       # (TB, A+1)
    a = comb.shape[-1] - 1
    cols = jax.lax.broadcasted_iota(jnp.int32, comb.shape, 1)
    out_ref[...] = jnp.where(cols == a, jnp.tanh(comb), comb)


# -----------------------------------------------------------------------------
# pallas_call wrapper (no host-side transpose; batch padded to a tile multiple)
# -----------------------------------------------------------------------------
def tictactoe_forward(kparams, x, cfg, block_b=512):
    H, Cin, A = cfg["board_size"], cfg["input_channels"], cfg["num_actions"]
    f_in = Cin * H * H

    # PyTorch x.view(-1, C, H, W) followed by NCHW flatten == plain reshape.
    x = x.reshape(-1, f_in).astype(jnp.float32)
    B = x.shape[0]

    # Batch tile: multiple of 8; aim for >=2 grid steps when there is enough
    # work so v7x's two TensorCores both get a share of the "parallel" axis.
    if B >= 16:
        TB = min(block_b, _round_up((B + 1) // 2, 8))
    else:
        TB = _round_up(max(B, 1), 8)
    Bp = _round_up(B, TB)
    if Bp != B:
        x = jnp.pad(x, ((0, Bp - B), (0, 0)))

    rep = lambda i: (0, 0)                       # weights: constant block index
    full = lambda a: pl.BlockSpec(a.shape, rep)  # full-array (untiled) block

    out = pl.pallas_call(
        _fused_forward_kernel,
        out_shape=jax.ShapeDtypeStruct((Bp, A + 1), jnp.float32),
        grid=(Bp // TB,),
        in_specs=[
            pl.BlockSpec((TB, f_in), lambda i: (i, 0)),          # boards
            full(kparams["w1"]), full(kparams["s1"]), full(kparams["b1"]),
            full(kparams["w2"]), full(kparams["s2"]), full(kparams["b2"]),
            full(kparams["wh1"]), full(kparams["bh1"]),
            full(kparams["wh2"]), full(kparams["bh2"]),
        ],
        out_specs=pl.BlockSpec((TB, A + 1), lambda i: (i, 0)),   # merged slab
        compiler_params=pltpu.CompilerParams(
            dimension_semantics=("parallel",)),
    )(x, kparams["w1"], kparams["s1"], kparams["b1"],
      kparams["w2"], kparams["s2"], kparams["b2"],
      kparams["wh1"], kparams["bh1"], kparams["wh2"], kparams["bh2"])

    policy = out[:B, :A]
    value = out[:B, A:A + 1]
    return value, policy


# -----------------------------------------------------------------------------
# Parameters: synthetic PyTorch-layout params + kernel-layout derivation
# -----------------------------------------------------------------------------
def init_torch_params(key, cfg):
    """Deterministic synthetic params in PyTorch layouts:
    Conv2d: w (Cout, Cin, kH, kW), b (Cout,); Linear: w (out, in), b (out,);
    BatchNorm2d: (gamma, beta, running_mean, running_var)."""
    Cin, H, A = cfg["input_channels"], cfg["board_size"], cfg["num_actions"]
    ks = iter(jax.random.split(key, 32))

    def conv(cout, cin):
        w = jax.random.normal(next(ks), (cout, cin, 3, 3), jnp.float32) * 0.1
        b = jax.random.normal(next(ks), (cout,), jnp.float32) * 0.1
        return w, b

    def bn(c):
        gamma = 1.0 + 0.1 * jax.random.normal(next(ks), (c,), jnp.float32)
        beta = 0.1 * jax.random.normal(next(ks), (c,), jnp.float32)
        mean = 0.05 * jax.random.normal(next(ks), (c,), jnp.float32)
        var = 1.0 + 0.1 * jnp.abs(jax.random.normal(next(ks), (c,), jnp.float32))
        return gamma, beta, mean, var

    def lin(out_f, in_f):
        w = jax.random.normal(next(ks), (out_f, in_f), jnp.float32) * 0.05
        b = jax.random.normal(next(ks), (out_f,), jnp.float32) * 0.05
        return w, b

    return {
        "conv1": conv(C1, Cin), "bn1": bn(C1),
        "conv2": conv(C2, C1), "bn2": bn(C2),
        "p_fc1": lin(HID, C2 * H * H), "p_fc2": lin(A, HID),
        "v_fc1": lin(HID, C2 * H * H), "v_fc2": lin(1, HID),
    }


def to_kernel_params(tp, cfg, eps=1e-5):
    """Re-lay-out PyTorch params for the kernel:
    - each 3x3/pad-1 conv on the fixed HxH board becomes a dense (Cin*M, Cout*M)
      matrix acting on NCHW-flattened vectors (index = c*M + y*H + x);
    - eval-mode BN + conv bias folded into per-channel affine, repeated to flat;
    - both FC1s concatenated; both FC2s fused into one block-diagonal matrix."""
    H, A = cfg["board_size"], cfg["num_actions"]
    M = H * H

    def conv_dense(w):
        w = np.asarray(w, np.float32)                 # (Cout, Cin, 3, 3)
        cout, cin = w.shape[0], w.shape[1]
        d = np.zeros((cin, H, H, cout, H, H), np.float32)
        for ky in range(3):
            for kx in range(3):
                for oy in range(H):
                    for ox in range(H):
                        iy, ix = oy + ky - 1, ox + kx - 1
                        if 0 <= iy < H and 0 <= ix < H:
                            d[:, iy, ix, :, oy, ox] += w[:, :, ky, kx].T
        return d.reshape(cin * M, cout * M)

    def bn_affine(conv_b, bnp):
        gamma, beta, mean, var = (np.asarray(t, np.float32) for t in bnp)
        scale = gamma / np.sqrt(var + eps)
        bias = beta + scale * (np.asarray(conv_b, np.float32) - mean)
        # per-channel -> channel-major (NCHW-flat) broadcast rows
        return (np.repeat(scale, M).reshape(1, -1).astype(np.float32),
                np.repeat(bias, M).reshape(1, -1).astype(np.float32))

    (w1, b1c), (w2, b2c) = tp["conv1"], tp["conv2"]
    s1, b1 = bn_affine(b1c, tp["bn1"])
    s2, b2 = bn_affine(b2c, tp["bn2"])

    wp1, bp1 = (np.asarray(t, np.float32) for t in tp["p_fc1"])
    wp2, bp2 = (np.asarray(t, np.float32) for t in tp["p_fc2"])
    wv1, bv1 = (np.asarray(t, np.float32) for t in tp["v_fc1"])
    wv2, bv2 = (np.asarray(t, np.float32) for t in tp["v_fc2"])
    hid = wp1.shape[0]

    # FC1 of both heads fused along the output dim (PyTorch NCHW-flatten order
    # already matches the kernel's channel-major activation layout).
    wh1 = np.concatenate([wp1.T, wv1.T], axis=1)                 # (C2*M, 2*HID)
    bh1 = np.concatenate([bp1, bv1]).reshape(1, -1)              # (1, 2*HID)

    # FC2 of both heads as one block-diagonal matmul -> merged (A+1)-wide slab.
    wh2 = np.zeros((2 * hid, A + 1), np.float32)
    wh2[:hid, :A] = wp2.T
    wh2[hid:, A] = wv2.reshape(-1)
    bh2 = np.concatenate([bp2, bv2]).reshape(1, -1)              # (1, A+1)

    bf16, f32 = jnp.bfloat16, jnp.float32
    return {
        "w1": jnp.asarray(conv_dense(w1), bf16),
        "s1": jnp.asarray(s1, f32), "b1": jnp.asarray(b1, f32),
        "w2": jnp.asarray(conv_dense(w2), bf16),
        "s2": jnp.asarray(s2, f32), "b2": jnp.asarray(b2, f32),
        "wh1": jnp.asarray(wh1, bf16), "bh1": jnp.asarray(bh1, f32),
        "wh2": jnp.asarray(wh2, bf16), "bh2": jnp.asarray(bh2, f32),
    }


# -----------------------------------------------------------------------------
# Pure-JAX (XLA) reference mirroring TicTacToeCNN.forward in eval() mode
# -----------------------------------------------------------------------------
def reference_forward(tp, x, cfg, eps=1e-5):
    H, Cin = cfg["board_size"], cfg["input_channels"]
    x = x.reshape(-1, Cin, H, H).astype(jnp.float32)
    dn = ("NCHW", "OIHW", "NCHW")

    def conv_bn_relu(x, conv, bnp):
        (w, b), (gamma, beta, mean, var) = conv, bnp
        y = jax.lax.conv_general_dilated(x, w, (1, 1), ((1, 1), (1, 1)),
                                         dimension_numbers=dn,
                                         precision=jax.lax.Precision.HIGHEST)
        y = y + b[None, :, None, None]
        y = (y - mean[None, :, None, None]) / jnp.sqrt(var[None, :, None, None] + eps)
        y = gamma[None, :, None, None] * y + beta[None, :, None, None]
        return jnp.maximum(y, 0.0)

    x = conv_bn_relu(x, tp["conv1"], tp["bn1"])
    x = conv_bn_relu(x, tp["conv2"], tp["bn2"])
    flat = x.reshape(x.shape[0], -1)                    # NCHW flatten (64*H*H)

    def lin(v, wb):
        w, b = wb
        return jnp.dot(v, w.T, precision=jax.lax.Precision.HIGHEST) + b

    policy = lin(jnp.maximum(lin(flat, tp["p_fc1"]), 0.0), tp["p_fc2"])
    value = jnp.tanh(lin(jnp.maximum(lin(flat, tp["v_fc1"]), 0.0), tp["v_fc2"]))
    return value, policy


# -----------------------------------------------------------------------------
# Main
# -----------------------------------------------------------------------------
if __name__ == "__main__":
    cfg = dict(input_channels=3, board_size=3, num_actions=9)

    key = jax.random.PRNGKey(0)
    pkey, xkey = jax.random.split(key)
    tparams = init_torch_params(pkey, cfg)
    kparams = to_kernel_params(tparams, cfg)

    batch = 4
    x = jax.random.normal(
        xkey, (batch, cfg["input_channels"], cfg["board_size"], cfg["board_size"]),
        dtype=jnp.float32)                               # PyTorch-style NCHW input

    fwd = jax.jit(lambda p, xx: tictactoe_forward(p, xx, cfg))
    value, policy = jax.block_until_ready(fwd(kparams, x))

    assert value.shape == (batch, 1)
    assert policy.shape == (batch, cfg["num_actions"])
    assert bool(jnp.all(jnp.isfinite(value))) and bool(jnp.all(jnp.isfinite(policy)))

    # Numerical check against a pure-JAX reference of the PyTorch module (eval
    # mode). Tolerance of 2e-2 is retained because the kernel deliberately uses
    # bf16 matmul operands (f32 accumulation) per the performance review.
    value_r, policy_r = reference_forward(tparams, x, cfg)
    assert bool(jnp.allclose(value, value_r, rtol=2e-2, atol=2e-2)), (
        float(jnp.max(jnp.abs(value - value_r))))
    assert bool(jnp.allclose(policy, policy_r, rtol=2e-2, atol=2e-2)), (
        float(jnp.max(jnp.abs(policy - policy_r))))

    print("KERNEL_OK")
</pallas_src>

<mosaic_0001>
module attributes {stable_mosaic.version = 11 : i64} {
  func.func @_fused_forward_kernel(%arg0: i32, %arg1: memref<8x27xf32, #tpu.memory_space<vmem>>, %arg2: memref<27x288xbf16, #tpu.memory_space<vmem>>, %arg3: memref<1x288xf32, #tpu.memory_space<vmem>>, %arg4: memref<1x288xf32, #tpu.memory_space<vmem>>, %arg5: memref<288x576xbf16, #tpu.memory_space<vmem>>, %arg6: memref<1x576xf32, #tpu.memory_space<vmem>>, %arg7: memref<1x576xf32, #tpu.memory_space<vmem>>, %arg8: memref<576x256xbf16, #tpu.memory_space<vmem>>, %arg9: memref<1x256xf32, #tpu.memory_space<vmem>>, %arg10: memref<256x10xbf16, #tpu.memory_space<vmem>>, %arg11: memref<1x10xf32, #tpu.memory_space<vmem>>, %arg12: memref<8x10xf32, #tpu.memory_space<vmem>>) attributes {dimension_semantics = [#tpu.dimension_semantics<parallel>], iteration_bounds = array<i64: 1>, scalar_prefetch = 0 : i64, scratch_operands = 0 : i64, tpu.core_type = #tpu.core_type<tc>, window_params = [{transform_indices = @transform_0, window_bounds = array<i64: 8, 27>}, {pipeline_mode = #tpu.pipeline_mode<synchronous>, transform_indices = @transform_1, window_bounds = array<i64: 27, 288>}, {pipeline_mode = #tpu.pipeline_mode<synchronous>, transform_indices = @transform_2, window_bounds = array<i64: 1, 288>}, {pipeline_mode = #tpu.pipeline_mode<synchronous>, transform_indices = @transform_3, window_bounds = array<i64: 1, 288>}, {pipeline_mode = #tpu.pipeline_mode<synchronous>, transform_indices = @transform_4, window_bounds = array<i64: 288, 576>}, {pipeline_mode = #tpu.pipeline_mode<synchronous>, transform_indices = @transform_5, window_bounds = array<i64: 1, 576>}, {pipeline_mode = #tpu.pipeline_mode<synchronous>, transform_indices = @transform_6, window_bounds = array<i64: 1, 576>}, {pipeline_mode = #tpu.pipeline_mode<synchronous>, transform_indices = @transform_7, window_bounds = array<i64: 576, 256>}, {pipeline_mode = #tpu.pipeline_mode<synchronous>, transform_indices = @transform_8, window_bounds = array<i64: 1, 256>}, {pipeline_mode = #tpu.pipeline_mode<synchronous>, transform_indices = @transform_9, window_bounds = array<i64: 256, 10>}, {pipeline_mode = #tpu.pipeline_mode<synchronous>, transform_indices = @transform_10, window_bounds = array<i64: 1, 10>}, {transform_indices = @transform_11, window_bounds = array<i64: 8, 10>}]} {
    %c0 = arith.constant 0 : index
    %c0_0 = arith.constant 0 : index
    %0 = vector.load %arg1[%c0, %c0_0] : memref<8x27xf32, #tpu.memory_space<vmem>>, vector<8x27xf32>
    %1 = arith.truncf %0 : vector<8x27xf32> to vector<8x27xbf16>
    %c0_1 = arith.constant 0 : index
    %c0_2 = arith.constant 0 : index
    %2 = vector.load %arg2[%c0_1, %c0_2] : memref<27x288xbf16, #tpu.memory_space<vmem>>, vector<27x288xbf16>
    %cst = arith.constant dense<0.000000e+00> : vector<8x288xf32>
    %3 = tpu.matmul %1, %2, %cst {dimension_numbers = #tpu.dot_dimension_numbers<[1], [0], [0], [1], [0, 0, 1, 1], [], []>} : vector<8x27xbf16>, vector<27x288xbf16>, vector<8x288xf32> -> vector<8x288xf32>
    %c0_3 = arith.constant 0 : index
    %c0_4 = arith.constant 0 : index
    %4 = vector.load %arg3[%c0_3, %c0_4] : memref<1x288xf32, #tpu.memory_space<vmem>>, vector<1x288xf32>
    %5 = vector.broadcast %4 : vector<1x288xf32> to vector<8x288xf32>
    %6 = arith.mulf %3, %5 : vector<8x288xf32>
    %c0_5 = arith.constant 0 : index
    %c0_6 = arith.constant 0 : index
    %7 = vector.load %arg4[%c0_5, %c0_6] : memref<1x288xf32, #tpu.memory_space<vmem>>, vector<1x288xf32>
    %8 = vector.broadcast %7 : vector<1x288xf32> to vector<8x288xf32>
    %9 = arith.addf %6, %8 : vector<8x288xf32>
    %cst_7 = arith.constant 0.000000e+00 : f32
    %10 = vector.broadcast %cst_7 : f32 to vector<8x288xf32>
    %11 = arith.maximumf %9, %10 : vector<8x288xf32>
    %12 = arith.truncf %11 : vector<8x288xf32> to vector<8x288xbf16>
    %c0_8 = arith.constant 0 : index
    %c0_9 = arith.constant 0 : index
    %13 = vector.load %arg5[%c0_8, %c0_9] : memref<288x576xbf16, #tpu.memory_space<vmem>>, vector<288x576xbf16>
    %cst_10 = arith.constant dense<0.000000e+00> : vector<8x576xf32>
    %14 = tpu.matmul %12, %13, %cst_10 {dimension_numbers = #tpu.dot_dimension_numbers<[1], [0], [0], [1], [0, 0, 1, 1], [], []>} : vector<8x288xbf16>, vector<288x576xbf16>, vector<8x576xf32> -> vector<8x576xf32>
    %c0_11 = arith.constant 0 : index
    %c0_12 = arith.constant 0 : index
    %15 = vector.load %arg6[%c0_11, %c0_12] : memref<1x576xf32, #tpu.memory_space<vmem>>, vector<1x576xf32>
    %16 = vector.broadcast %15 : vector<1x576xf32> to vector<8x576xf32>
    %17 = arith.mulf %14, %16 : vector<8x576xf32>
    %c0_13 = arith.constant 0 : index
    %c0_14 = arith.constant 0 : index
    %18 = vector.load %arg7[%c0_13, %c0_14] : memref<1x576xf32, #tpu.memory_space<vmem>>, vector<1x576xf32>
    %19 = vector.broadcast %18 : vector<1x576xf32> to vector<8x576xf32>
    %20 = arith.addf %17, %19 : vector<8x576xf32>
    %cst_15 = arith.constant 0.000000e+00 : f32
    %21 = vector.broadcast %cst_15 : f32 to vector<8x576xf32>
    %22 = arith.maximumf %20, %21 : vector<8x576xf32>
    %23 = arith.truncf %22 : vector<8x576xf32> to vector<8x576xbf16>
    %c0_16 = arith.constant 0 : index
    %c0_17 = arith.constant 0 : index
    %24 = vector.load %arg8[%c0_16, %c0_17] : memref<576x256xbf16, #tpu.memory_space<vmem>>, vector<576x256xbf16>
    %cst_18 = arith.constant dense<0.000000e+00> : vector<8x256xf32>
    %25 = tpu.matmul %23, %24, %cst_18 {dimension_numbers = #tpu.dot_dimension_numbers<[1], [0], [0], [1], [0, 0, 1, 1], [], []>} : vector<8x576xbf16>, vector<576x256xbf16>, vector<8x256xf32> -> vector<8x256xf32>
    %c0_19 = arith.constant 0 : index
    %c0_20 = arith.constant 0 : index
    %26 = vector.load %arg9[%c0_19, %c0_20] : memref<1x256xf32, #tpu.memory_space<vmem>>, vector<1x256xf32>
    %27 = vector.broadcast %26 : vector<1x256xf32> to vector<8x256xf32>
    %28 = arith.addf %25, %27 : vector<8x256xf32>
    %cst_21 = arith.constant 0.000000e+00 : f32
    %29 = vector.broadcast %cst_21 : f32 to vector<8x256xf32>
    %30 = arith.maximumf %28, %29 : vector<8x256xf32>
    %31 = arith.truncf %30 : vector<8x256xf32> to vector<8x256xbf16>
    %c0_22 = arith.constant 0 : index
    %c0_23 = arith.constant 0 : index
    %32 = vector.load %arg10[%c0_22, %c0_23] : memref<256x10xbf16, #tpu.memory_space<vmem>>, vector<256x10xbf16>
    %cst_24 = arith.constant dense<0.000000e+00> : vector<8x10xf32>
    %33 = tpu.matmul %31, %32, %cst_24 {dimension_numbers = #tpu.dot_dimension_numbers<[1], [0], [0], [1], [0, 0, 1, 1], [], []>} : vector<8x256xbf16>, vector<256x10xbf16>, vector<8x10xf32> -> vector<8x10xf32>
    %c0_25 = arith.constant 0 : index
    %c0_26 = arith.constant 0 : index
    %34 = vector.load %arg11[%c0_25, %c0_26] : memref<1x10xf32, #tpu.memory_space<vmem>>, vector<1x10xf32>
    %35 = vector.broadcast %34 : vector<1x10xf32> to vector<8x10xf32>
    %36 = arith.addf %33, %35 : vector<8x10xf32>
    %37 = tpu.iota {dimensions = array<i32: 1>} : vector<8x10xi32>
    %c9_i32 = arith.constant 9 : i32
    %38 = vector.broadcast %c9_i32 : i32 to vector<8x10xi32>
    %39 = arith.cmpi eq, %37, %38 : vector<8x10xi32>
    %40 = math.tanh %36 : vector<8x10xf32>
    %41 = arith.select %39, %40, %36 : vector<8x10xi1>, vector<8x10xf32>
    %c0_27 = arith.constant 0 : index
    %c0_28 = arith.constant 0 : index
    %42 = vector.load %arg12[%c0_27, %c0_28] : memref<8x10xf32, #tpu.memory_space<vmem>>, vector<8x10xf32>
    tpu.vector_store %arg12[%c0_27, %c0_28], %41 {strides = array<i32>} : memref<8x10xf32, #tpu.memory_space<vmem>>, vector<8x10xf32>,
    return
  }
  func.func @transform_0(%arg0: i32) -> (i32, i32) {
    %c0_i32 = arith.constant 0 : i32
    %c0_i32_0 = arith.constant 0 : i32
    return %arg0, %c0_i32 : i32, i32
  }
  func.func @transform_1(%arg0: i32) -> (i32, i32) {
    %c0_i32 = arith.constant 0 : i32
    %c0_i32_0 = arith.constant 0 : i32
    %c0_i32_1 = arith.constant 0 : i32
    return %c0_i32, %c0_i32_0 : i32, i32
  }
  func.func @transform_2(%arg0: i32) -> (i32, i32) {
    %c0_i32 = arith.constant 0 : i32
    %c0_i32_0 = arith.constant 0 : i32
    %c0_i32_1 = arith.constant 0 : i32
    return %c0_i32, %c0_i32_0 : i32, i32
  }
  func.func @transform_3(%arg0: i32) -> (i32, i32) {
    %c0_i32 = arith.constant 0 : i32
    %c0_i32_0 = arith.constant 0 : i32
    %c0_i32_1 = arith.constant 0 : i32
    return %c0_i32, %c0_i32_0 : i32, i32
  }
  func.func @transform_4(%arg0: i32) -> (i32, i32) {
    %c0_i32 = arith.constant 0 : i32
    %c0_i32_0 = arith.constant 0 : i32
    %c0_i32_1 = arith.constant 0 : i32
    return %c0_i32, %c0_i32_0 : i32, i32
  }
  func.func @transform_5(%arg0: i32) -> (i32, i32) {
    %c0_i32 = arith.constant 0 : i32
    %c0_i32_0 = arith.constant 0 : i32
    %c0_i32_1 = arith.constant 0 : i32
    return %c0_i32, %c0_i32_0 : i32, i32
  }
  func.func @transform_6(%arg0: i32) -> (i32, i32) {
    %c0_i32 = arith.constant 0 : i32
    %c0_i32_0 = arith.constant 0 : i32
    %c0_i32_1 = arith.constant 0 : i32
    return %c0_i32, %c0_i32_0 : i32, i32
  }
  func.func @transform_7(%arg0: i32) -> (i32, i32) {
    %c0_i32 = arith.constant 0 : i32
    %c0_i32_0 = arith.constant 0 : i32
    %c0_i32_1 = arith.constant 0 : i32
    return %c0_i32, %c0_i32_0 : i32, i32
  }
  func.func @transform_8(%arg0: i32) -> (i32, i32) {
    %c0_i32 = arith.constant 0 : i32
    %c0_i32_0 = arith.constant 0 : i32
    %c0_i32_1 = arith.constant 0 : i32
    return %c0_i32, %c0_i32_0 : i32, i32
  }
  func.func @transform_9(%arg0: i32) -> (i32, i32) {
    %c0_i32 = arith.constant 0 : i32
    %c0_i32_0 = arith.constant 0 : i32
    %c0_i32_1 = arith.constant 0 : i32
    return %c0_i32, %c0_i32_0 : i32, i32
  }
  func.func @transform_10(%arg0: i32) -> (i32, i32) {
    %c0_i32 = arith.constant 0 : i32
    %c0_i32_0 = arith.constant 0 : i32
    %c0_i32_1 = arith.constant 0 : i32
    return %c0_i32, %c0_i32_0 : i32, i32
  }
  func.func @transform_11(%arg0: i32) -> (i32, i32) {
    %c0_i32 = arith.constant 0 : i32
    %c0_i32_0 = arith.constant 0 : i32
    return %arg0, %c0_i32 : i32, i32
  }
}

</mosaic_0001>

<bundles_post_ra>
// kernel: _lambda_.1
= control target key start
LH: loop header
LB: loop body
LE: loop exit
PB: predicated region body
PF: predicated region fallthrough
CT: control target
= control target key end

     0   :  { %16 = vsyncpa [#allocation3], 0  ;;  %s2763_s0 = inlined_call_operand.vmem [shape: f32[8,27], index: 0, kind: input, shape index: {}]   ;;  %s2764_s1 = inlined_call_operand.vmem [shape: bf16[27,288], index: 1, kind: input, shape index: {}]   ;;  %s2765_s2 = inlined_call_operand.vmem [shape: f32[1,288], index: 2, kind: input, shape index: {}]   ;;  %s2766_s3 = inlined_call_operand.vmem [shape: f32[1,288], index: 3, kind: input, shape index: {}]   ;;  %s2767_s4 = inlined_call_operand.hbm [shape: bf16[288,576], index: 4, kind: input, shape index: {}]   ;;  %s2768_s5 = inlined_call_operand.vmem [shape: f32[1,576], index: 5, kind: input, shape index: {}]   ;;  %s2769_s6 = inlined_call_operand.vmem [shape: f32[1,576], index: 6, kind: input, shape index: {}]   ;;  %s2770_s7 = inlined_call_operand.hbm [shape: bf16[576,256], index: 7, kind: input, shape index: {}]   ;;  %s2771_s8 = inlined_call_operand.vmem [shape: f32[1,256], index: 8, kind: input, shape index: {}]   ;;  %s2772_s9 = inlined_call_operand.vmem [shape: bf16[256,10], index: 9, kind: input, shape index: {}]   ;;  %s2773_s10 = inlined_call_operand.vmem [shape: f32[1,10], index: 10, kind: input, shape index: {}]   ;;  %s2774_s11 = inlined_call_operand.vmem [shape: f32[8,10], index: 11, kind: output, shape index: {}]  }
   0x1   :  { %17 = vsyncpa [#allocation5], 0  ;;  %s2500_s17 = smov [#allocation2]   ;;  %s2452_s21 = scalar_lea.hbm %s2767_s4, 11520 }
   0x2   :  { %s31_s18 = sshll.u32 %s2500_s17, 4  ;;  %p2453_p0 = scmp.ne.s32.totalorder %s2767_s4, %s2452_s21  ;;  %s32_s18 = int_to_ptr.vmem [resolvable:$true] %s31_s18 }
   0x3   :  { %p2456_p1 = scmp.lt.u32.totalorder %s2452_s21, %s2767_s4 }
   0x5   :  { %p2458_p2 = pnand %p2456_p1, %p2453_p0 }
   0x7   :  { %2461 = shalt.err (!%p2458_p2)
}
   0x8   :  { %s2462_s26 = scalar_lea.vmem %s32_s18, 11520  ;;  %p2467_p4 = scmp.lt.s32.totalorder %s32_s18, %s32_s18 }
   0x9   :  { %p2463_p3 = scmp.ne.s32.totalorder %s32_s18, %s2462_s26  ;;  %p2468_p5 = scmp.lt.s32.totalorder %s2462_s26, %s2462_s26 }
   0xb   :  { %p2469_p6 = por %p2468_p5, %p2467_p4 }
   0xd   :  { %p2470_p7 = pnand %p2469_p6, %p2463_p3 }
   0xf   :  { %2473 = shalt.err (!%p2470_p7)
}
  0x10   :  { %s2501_s27 = smov 320   ;;  %s2502_s28 = smov 20  }
  0x11   :  { %37 = dma.hbm_to_vmem [thread:$0]  %s2767_s4, 11520, %s32_s18, [#allocation3], %s2501_s27, %s2501_s27, %s2502_s28  }
  0x12   :  { %s2503_s12 = smov [#allocation4]   ;;  %s2474_s16 = scalar_lea.hbm %s2770_s7, 9216 }
  0x13   :  { %s47_s13 = sshll.u32 %s2503_s12, 4  ;;  %p2475_p8 = scmp.ne.s32.totalorder %s2770_s7, %s2474_s16  ;;  %s48_s13 = int_to_ptr.vmem [resolvable:$true] %s47_s13 }
  0x14   :  { %p2478_p9 = scmp.lt.u32.totalorder %s2474_s16, %s2770_s7 }
  0x16   :  { %p2480_p10 = pnand %p2478_p9, %p2475_p8 }
  0x18   :  { %2483 = shalt.err (!%p2480_p10)
}
  0x19   :  { %s2484_s22 = scalar_lea.vmem %s48_s13, 9216  ;;  %p2489_p12 = scmp.lt.s32.totalorder %s48_s13, %s48_s13 }
  0x1a   :  { %p2485_p11 = scmp.ne.s32.totalorder %s48_s13, %s2484_s22  ;;  %p2490_p13 = scmp.lt.s32.totalorder %s2484_s22, %s2484_s22 }
  0x1c   :  { %p2491_p0 = por %p2490_p13, %p2489_p12 }
  0x1e   :  { %p2492_p1 = pnand %p2491_p0, %p2485_p11 }
  0x20   :  { %2495 = shalt.err (!%p2492_p1)
}
  0x21   :  { %s2504_s4 = smov 128   ;;  %s2505_s18 = smov 8  }
  0x22   :  { %53 = dma.hbm_to_vmem [thread:$0]  %s2770_s7, 9216, %s48_s13, [#allocation5], %s2504_s4, %s2504_s4, %s2505_s18  }
  0x23   :  { %2496 = dma.done.wait [#allocation3], 11520  }
  0x24   :  { %2497 = vsyncadd [#allocation3], 4294955776 }
  0x25   :  { %2498 = dma.done.wait [#allocation5], 9216  }
  0x26   :  { %2499 = vsyncadd [#allocation5], 4294958080  ;;  %v2506_v0 = vmov 0   ;;  %vm110_vm0 = vcmask 1044480   ;;  %vm111_vm1 = vcmask 1045504   ;;  %v2507_v1 = vmov 65535  }
  0x27   :  { %155 = vmatprep.mubr.bf16.mxu1 %v2506_v0  ;;  %v112_v2 = vsel %vm110_vm0, 4294967295, %v2507_v1  ;;  %v2192_v3 = vld [vmem:[%s2764_s1 + $0x4] ss:$12 sps:$4 sm:$0xff]   ;;  %v2194_v4 = vld [vmem:[%s2764_s1] ss:$12 sps:$4 sm:$0xff]   ;;  %vm106_vm2 = vcmask 220160   ;;  %v206_v54 = vlaneseq }
  0x28   :  { %v113_v5 = vsel %vm111_vm1, %v112_v2, 0  ;;  %123 = vmatprep.subr.bf16.mxu1 %v2192_v3  ;;  %v2195_v6 = vld [vmem:[%s2764_s1 + $0x1c] ss:$12 sps:$4 sm:$0x3f]   ;;  %v67_v8 = vld [vmem:[%s2763_s0] sm:$0xff]  ;;  %v2508_v17 = vmov 0.0  }
  0x29   :  { %v2197_v7 = vld [vmem:[%s2764_s1 + $0x18] ss:$12 sps:$4 sm:$0x3f]   ;;  %124 = vmatpush1.bf16.msra.mxu1 %v2194_v4  ;;  %v118_v9 = vand.u32 %v2195_v6, %v113_v5  ;;  %v2198_v11 = vld [vmem:[%s2764_s1 + $0x8] ss:$12 sps:$4 sm:$0xff]   ;;  %v68_v12 = vpack.c.bf16 %v67_v8, %v67_v8  ;;  %vm2509_vm3 = vmmov 0  }
  0x2a   :  { %v115_v10 = vand.u32 %v2197_v7, %v113_v5  ;;  %v2200_v13 = vld [vmem:[#allocation2 + $0x4] ss:$20 sps:$4 sm:$0xff]   ;;  %v2202_v14 = vld [vmem:[#allocation2] ss:$20 sps:$4 sm:$0xff]   ;;  %v2205_v18 = vld [vmem:[#allocation2 + $0x28] ss:$20 sps:$4 sm:$0xff]  }
  0x2b   :  { %125 = vmatprep.subr.bf16.mxu1 %v118_v9  ;;  %v2199_v15 = vld [vmem:[%s2764_s1 + $0x20] ss:$12 sps:$4 sm:$0x3f]   ;;  %830 = vmatprep.subr.bf16.mxu0 %v2200_v13  ;;  %v2206_v19 = vld [vmem:[#allocation2 + $0x54] ss:$20 sps:$4 sm:$0xff]   ;;  %v2624_v55 = vshrl.u32 %v206_v54, 7 }
  0x2c   :  { %v2203_v16 = vld [vmem:[#allocation2 + $0x2c] ss:$20 sps:$4 sm:$0xff]   ;;  %831 = vmatpush1.bf16.msra.mxu0 %v2202_v14  ;;  %v121_v20 = vand.u32 %v2199_v15, %v113_v5  ;;  %v2208_v21 = vld [vmem:[#allocation2 + $0x50] ss:$20 sps:$4 sm:$0xff]   ;;  %v2217_v27 = vld [vmem:[#allocation2 + $0xc8] ss:$20 sps:$4 sm:$0xff]  }
  0x2d   :  { %126 = vmatpush1.bf16.msra.mxu1 %v115_v10  ;;  %832 = vmatprep.subr.bf16.mxu0 %v2203_v16  ;;  %v2209_v22 = vld [vmem:[#allocation2 + $0x7c] ss:$20 sps:$4 sm:$0xff]   ;;  %v2211_v23 = vld [vmem:[#allocation2 + $0x78] ss:$20 sps:$4 sm:$0xff]   ;;  %v2214_v25 = vld [vmem:[#allocation2 + $0xa0] ss:$20 sps:$4 sm:$0xff]  }
  0x2e   :  { %2152 = vmatprep.subr.bf16.mxu1 %v2508_v17  ;;  %v2212_v24 = vld [vmem:[#allocation2 + $0xa4] ss:$20 sps:$4 sm:$0xff]   ;;  %v2215_v26 = vld [vmem:[#allocation2 + $0xcc] ss:$20 sps:$4 sm:$0xff]   ;;  %v2218_v28 = vld [vmem:[#allocation2 + $0xf4] ss:$20 sps:$4 sm:$0xff]  }
  0x2f   :  { %v2220_v29 = vld [vmem:[#allocation2 + $0xf0] ss:$20 sps:$4 sm:$0xff]   ;;  %v2223_v31 = vld [vmem:[#allocation2 + $0x118] ss:$20 sps:$4 sm:$0xff]   ;;  %v2226_v33 = vld [vmem:[#allocation2 + $0x140] ss:$20 sps:$4 sm:$0xff]  }
  0x30   :  { %1917 = vmatmul.mubr.msk.bf16.vlgmr.msra.gmra.mrb[0].mxu1 %vm106_vm2, %v68_v12  ;;  %833 = vmatpush1.bf16.msra.mxu0 %v2205_v18  ;;  %v2221_v30 = vld [vmem:[#allocation2 + $0x11c] ss:$20 sps:$4 sm:$0xff]   ;;  %v2224_v32 = vld [vmem:[#allocation2 + $0x144] ss:$20 sps:$4 sm:$0xff]   ;;  %v2227_v34 = vld [vmem:[#allocation2 + $0x16c] ss:$20 sps:$4 sm:$0xff]  }
  0x31   :  { %2153 = vmatpush3.bf16.msra.mxu1 %v2198_v11  ;;  %2156 = vmatprep.mubr.msk.bf16.mxu1 %vm2509_vm3, %v2508_v17  ;;  %v2229_v35 = vld [vmem:[#allocation2 + $0x168] ss:$20 sps:$4 sm:$0xff]   ;;  %v2232_v37 = vld [vmem:[#allocation2 + $0x190] ss:$20 sps:$4 sm:$0xff]   ;;  %v2235_v39 = vld [vmem:[#allocation2 + $0x1b8] ss:$20 sps:$4 sm:$0xff]  }
  0x32   :  { %2154 = vmatprep.subr.bf16.mxu1 %v2508_v17  ;;  %834 = vmatprep.subr.bf16.mxu0 %v2206_v19  ;;  %v2230_v36 = vld [vmem:[#allocation2 + $0x194] ss:$20 sps:$4 sm:$0xff]   ;;  %v2233_v38 = vld [vmem:[#allocation2 + $0x1bc] ss:$20 sps:$4 sm:$0xff]   ;;  %v2236_v40 = vld [vmem:[#allocation2 + $0x1e4] ss:$20 sps:$4 sm:$0xff]  }
  0x33   :  { %v2238_v41 = vld [vmem:[#allocation2 + $0x1e0] ss:$20 sps:$4 sm:$0xff]   ;;  %v2241_v43 = vld [vmem:[#allocation2 + $0x208] ss:$20 sps:$4 sm:$0xff]   ;;  %v2244_v45 = vld [vmem:[#allocation2 + $0x230] ss:$20 sps:$4 sm:$0xff]  }
  0x34   :  { %835 = vmatpush1.bf16.msra.mxu0 %v2208_v21  ;;  %v2239_v42 = vld [vmem:[#allocation2 + $0x20c] ss:$20 sps:$4 sm:$0xff]   ;;  %v2242_v44 = vld [vmem:[#allocation2 + $0x234] ss:$20 sps:$4 sm:$0xff]   ;;  %v2245_v46 = vld [vmem:[#allocation2 + $0x25c] ss:$20 sps:$4 sm:$0xff]  }
  0x35   :  { %2155 = vmatpush3.bf16.msra.mxu1 %v121_v20  ;;  %836 = vmatprep.subr.bf16.mxu0 %v2209_v22  ;;  %v2247_v47 = vld [vmem:[#allocation2 + $0x258] ss:$20 sps:$4 sm:$0xff]   ;;  %v2248_v49 = vld [vmem:[#allocation2 + $0x280] ss:$20 sps:$4 sm:$0xff]   ;;  %v2254_v52 = vld [vmem:[#allocation2 + $0x2a8] ss:$20 sps:$4 sm:$0xff]  }
  0x36   :  { %v2250_v48 = vld [vmem:[#allocation2 + $0x284] ss:$20 sps:$4 sm:$0xff]   ;;  %v2253_v50 = vld [vmem:[#allocation2 + $0xc] ss:$20 sps:$4 sm:$0xff]   ;;  %v2627_v56 = vsub.s32 0, %v2624_v55  ;;  %v2633_v58 = vsub.s32 1, %v2624_v55 }
  0x37   :  { %871 = vmatprep.subr.bf16.mxu1 %v2250_v48  ;;  %v2256_v51 = vld [vmem:[#allocation2 + $0x2ac] ss:$20 sps:$4 sm:$0xff]   ;;  %v2643_v4 = vsub.s32 2, %v2624_v55  ;;  %v2251_v16 = vld [vmem:[#allocation2 + $0x8] ss:$20 sps:$4 sm:$0xff]   ;;  %vm826_vm4 = vcmask 261120  }
  0x38   :  { %2157 = vmatmul.mubr.msk.bf16.vlgmr.msra.gmra.mrb[4].mxu1 %vm106_vm2, %v68_v12  ;;  %837 = vmatpush1.bf16.msra.mxu0 %v2211_v23  ;;  %v2262_v53 = vld [vmem:[#allocation2 + $0x28c] ss:$20 sps:$4 sm:$0xff]   ;;  %v2259_v20 = vld [vmem:[#allocation2 + $0x34] ss:$20 sps:$4 sm:$0xff]   ;;  %vm1592_vm5 = vcmask 523264   ;;  %vm1903_vm7 = vcmask 80896  }
  0x39   :  { %903 = vmatprep.mubr.bf16.mxu1 %v2506_v0  ;;  %838 = vmatprep.subr.bf16.mxu0 %v2212_v24  ;;  %v204_v57 = vld [vmem:[%s2765_s2] sm:$0x7]  ;;  %v2334_v48 = vld [vmem:[#allocation4 + $0x24] ss:$8 sps:$4 sm:$0xff]  }
  0x3a   :  { %872 = vmatpush1.bf16.msra.mxu1 %v2248_v49  ;;  %v224_v59 = vld [vmem:[%s2766_s3] sm:$0x7]  ;;  %v209_v60 = vrot.slane %v204_v57, %v2627_v56  ;;  %v213_v61 = vrot.slane %v204_v57, %v2633_v58  ;;  %v217_v11 = vrot.slane %v204_v57, %v2643_v4 }
  0x3b   :  { %873 = vmatprep.subr.bf16.mxu1 %v2256_v51  ;;  %v229_v62 = vrot.slane %v224_v59, %v2627_v56  ;;  %v233_v1 = vrot.slane %v224_v59, %v2633_v58  ;;  %v237_v13 = vrot.slane %v224_v59, %v2643_v4  ;;  %v2288_v49 = vld [vmem:[#allocation2 + $0x14c] ss:$20 sps:$4 sm:$0xff]   ;;  %v2340_v59 = vld [vmem:[#allocation4 + $0x44] ss:$8 sps:$4 sm:$0xff]  }
  0x3c   :  { %839 = vmatpush1.bf16.msra.mxu0 %v2214_v25  ;;  %v2257_v25 = vld [vmem:[#allocation2 + $0x30] ss:$20 sps:$4 sm:$0xff]   ;;  %v2335_v57 = vld [vmem:[#allocation4 + $0x30] ss:$8 sps:$4 sm:$0xff]  }
  0x3d   :  { %840 = vmatprep.subr.bf16.mxu0 %v2215_v26  ;;  %v2337_v51 = vld [vmem:[#allocation4 + $0x34] ss:$8 sps:$4 sm:$0xff]  }
  0x3e   :  { %874 = vmatpush1.bf16.msra.mxu1 %v2254_v52  ;;  %v2286_v52 = vld [vmem:[#allocation2 + $0x148] ss:$20 sps:$4 sm:$0xff]  }
  0x3f   :  { %953 = vmatprep.subr.bf16.mxu1 %v2262_v53  ;;  %v2291_v53 = vld [vmem:[#allocation2 + $0x174] ss:$20 sps:$4 sm:$0xff]  }
  0x40   :  { %841 = vmatpush1.bf16.msra.mxu0 %v2217_v27  ;;  %v2265_v27 = vld [vmem:[#allocation2 + $0x5c] ss:$20 sps:$4 sm:$0xff]  }
  0x41   :  { %842 = vmatprep.subr.bf16.mxu0 %v2218_v28  ;;  %v2260_v28 = vld [vmem:[#allocation2 + $0x288] ss:$20 sps:$4 sm:$0xff]  }
  0x44   :  { %843 = vmatpush1.bf16.msra.mxu0 %v2220_v29 }
  0x45   :  { %844 = vmatprep.subr.bf16.mxu0 %v2221_v30  ;;  %v2268_v30 = vld [vmem:[#allocation2 + $0x2b4] ss:$20 sps:$4 sm:$0xff]  }
  0x48   :  { %845 = vmatpush1.bf16.msra.mxu0 %v2223_v31  ;;  %v2263_v31 = vld [vmem:[#allocation2 + $0x58] ss:$20 sps:$4 sm:$0xff]  }
  0x49   :  { %846 = vmatprep.subr.bf16.mxu0 %v2224_v32  ;;  %v2271_v32 = vld [vmem:[#allocation2 + $0x84] ss:$20 sps:$4 sm:$0xff]  }
  0x4c   :  { %847 = vmatpush1.bf16.msra.mxu0 %v2226_v33  ;;  %v2266_v33 = vld [vmem:[#allocation2 + $0x2b0] ss:$20 sps:$4 sm:$0xff]  }
  0x4d   :  { %848 = vmatprep.subr.bf16.mxu0 %v2227_v34  ;;  %v2269_v34 = vld [vmem:[#allocation2 + $0x80] ss:$20 sps:$4 sm:$0xff]  }
  0x50   :  { %849 = vmatpush1.bf16.msra.mxu0 %v2229_v35  ;;  %v2274_v35 = vld [vmem:[#allocation2 + $0xac] ss:$20 sps:$4 sm:$0xff]  }
  0x51   :  { %850 = vmatprep.subr.bf16.mxu0 %v2230_v36  ;;  %v2275_v36 = vld [vmem:[#allocation2 + $0x290] ss:$20 sps:$4 sm:$0xff]  }
  0x54   :  { %851 = vmatpush1.bf16.msra.mxu0 %v2232_v37  ;;  %v2272_v37 = vld [vmem:[#allocation2 + $0xa8] ss:$20 sps:$4 sm:$0xff]  }
  0x55   :  { %852 = vmatprep.subr.bf16.mxu0 %v2233_v38  ;;  %v2278_v38 = vld [vmem:[#allocation2 + $0xd4] ss:$20 sps:$4 sm:$0xff]  }
  0x58   :  { %853 = vmatpush1.bf16.msra.mxu0 %v2235_v39  ;;  %v2279_v39 = vld [vmem:[#allocation2 + $0x2b8] ss:$20 sps:$4 sm:$0xff]  }
  0x59   :  { %854 = vmatprep.subr.bf16.mxu0 %v2236_v40  ;;  %v2328_v40 = vld [vmem:[#allocation4 + $0x4] ss:$8 sps:$4 sm:$0xff]  }
  0x5c   :  { %855 = vmatpush1.bf16.msra.mxu0 %v2238_v41  ;;  %v2276_v41 = vld [vmem:[#allocation2 + $0xd0] ss:$20 sps:$4 sm:$0xff]  }
  0x5d   :  { %856 = vmatprep.subr.bf16.mxu0 %v2239_v42  ;;  %v2282_v42 = vld [vmem:[#allocation2 + $0xfc] ss:$20 sps:$4 sm:$0xff]  }
  0x60   :  { %857 = vmatpush1.bf16.msra.mxu0 %v2241_v43  ;;  %v2326_v43 = vld [vmem:[#allocation4] ss:$8 sps:$4 sm:$0xff]  }
  0x61   :  { %858 = vmatprep.subr.bf16.mxu0 %v2242_v44  ;;  %v2331_v44 = vld [vmem:[#allocation4 + $0x14] ss:$8 sps:$4 sm:$0xff]  }
  0x64   :  { %859 = vmatpush1.bf16.msra.mxu0 %v2244_v45  ;;  %v2280_v45 = vld [vmem:[#allocation2 + $0xf8] ss:$20 sps:$4 sm:$0xff]  }
  0x65   :  { %860 = vmatprep.subr.bf16.mxu0 %v2245_v46  ;;  %v2285_v46 = vld [vmem:[#allocation2 + $0x124] ss:$20 sps:$4 sm:$0xff]  }
  0x68   :  { %861 = vmatpush1.bf16.msra.mxu0 %v2247_v47  ;;  %v2329_v47 = vld [vmem:[#allocation4 + $0x10] ss:$8 sps:$4 sm:$0xff]  }
  0x69   :  { %912 = vmatprep.subr.bf16.mxu0 %v2253_v50  ;;  %v2332_v50 = vld [vmem:[#allocation4 + $0x20] ss:$8 sps:$4 sm:$0xff]  }
 0x103   :  { %v157_v63 = vpop.f32.mrb[0].mxu1 }
 0x104   :  { %v221_v2 = vmul.f32 %v209_v60, %v157_v63  ;;  %v159_v3 = vpop.f32.mrb[1].mxu1  ;;  %v2289_v60 = vld [vmem:[#allocation2 + $0x170] ss:$20 sps:$4 sm:$0xff]  }
 0x105   :  { %v222_v5 = vmul.f32 %v213_v61, %v159_v3  ;;  %v161_v6 = vpop.f32.mrb[2].mxu1  ;;  %v2294_v61 = vld [vmem:[#allocation2 + $0x19c] ss:$20 sps:$4 sm:$0xff]   ;;  %v2343_v63 = vld [vmem:[#allocation4 + $0x54] ss:$8 sps:$4 sm:$0xff]  }
 0x106   :  { %v241_v7 = vadd.f32 %v229_v62, %v221_v2  ;;  %v162_v8 = vpop.f32.mrb[3].mxu1  ;;  %v2338_v62 = vld [vmem:[#allocation4 + $0x40] ss:$8 sps:$4 sm:$0xff]   ;;  %v2341_v3 = vld [vmem:[#allocation4 + $0x50] ss:$8 sps:$4 sm:$0xff]  }
 0x107   :  { %v242_v9 = vadd.f32 %v233_v1, %v222_v5  ;;  %v2292_v1 = vld [vmem:[#allocation2 + $0x198] ss:$20 sps:$4 sm:$0xff]   ;;  %v2346_v5 = vld [vmem:[#allocation4 + $0x64] ss:$8 sps:$4 sm:$0xff]  }
 0x108   :  { %v244_v10 = vmax.f32 %v241_v7, 0.0  ;;  %v2297_v2 = vld [vmem:[#allocation2 + $0x1c4] ss:$20 sps:$4 sm:$0xff]   ;;  %v2295_v6 = vld [vmem:[#allocation2 + $0x1c0] ss:$20 sps:$4 sm:$0xff]  }
 0x109   :  { %v245_v12 = vmax.f32 %v242_v9, 0.0  ;;  %v2300_v7 = vld [vmem:[#allocation2 + $0x1ec] ss:$20 sps:$4 sm:$0xff]   ;;  %v2344_v8 = vld [vmem:[#allocation4 + $0x60] ss:$8 sps:$4 sm:$0xff]  }
 0x10a   :  { %v2649_v18 = vpack.c.bf16 %v244_v10, %v244_v10  ;;  %v2349_v9 = vld [vmem:[#allocation4 + $0x74] ss:$8 sps:$4 sm:$0xff]   ;;  %v2298_v10 = vld [vmem:[#allocation2 + $0x1e8] ss:$20 sps:$4 sm:$0xff]  }
 0x10b   :  { %v2647_v14 = vpack.c.bf16 %v245_v12, %v245_v12  ;;  %v198_v15 = vpop.f32.mrb[4].mxu1  ;;  %v2347_v12 = vld [vmem:[#allocation4 + $0x70] ss:$8 sps:$4 sm:$0xff]  }
 0x10c   :  { %v223_v19 = vmul.f32 %v217_v11, %v198_v15  ;;  %v2158_v21 = vpop.f32.mrb[5].mxu1  ;;  %v2303_v11 = vld [vmem:[#allocation2 + $0x214] ss:$20 sps:$4 sm:$0xff]   ;;  %v2301_v15 = vld [vmem:[#allocation2 + $0x210] ss:$20 sps:$4 sm:$0xff]  }
 0x10d   :  { %862 = vmatprep.mubr.bf16.mxu0 %v2647_v14  ;;  %v201_v22 = vpop.f32.mrb[6].mxu1  ;;  %v2304_v21 = vld [vmem:[#allocation2 + $0x238] ss:$20 sps:$4 sm:$0xff]  }
 0x10e   :  { %v243_v23 = vadd.f32 %v237_v13, %v223_v19  ;;  %863 = vmatmul.mubr.bf16.vlgmr.msra.gmra.mrb[0].mxu0 %v2649_v18  ;;  %v2159_v24 = vpop.f32.mrb[7].mxu1  ;;  %v2352_v13 = vld [vmem:[#allocation4 + $0x84] ss:$8 sps:$4 sm:$0xff]   ;;  %v2350_v19 = vld [vmem:[#allocation4 + $0x80] ss:$8 sps:$4 sm:$0xff]  }
 0x10f   :  { %913 = vmatpush1.bf16.msra.mxu0 %v2251_v16  ;;  %944 = vmatprep.mubr.bf16.mxu0 %v2647_v14  ;;  %v2306_v16 = vld [vmem:[#allocation2 + $0x23c] ss:$20 sps:$4 sm:$0xff]   ;;  %v2309_v22 = vld [vmem:[#allocation2 + $0x264] ss:$20 sps:$4 sm:$0xff]  }
 0x110   :  { %v246_v26 = vmax.f32 %v243_v23, 0.0  ;;  %914 = vmatprep.subr.bf16.mxu0 %v2259_v20  ;;  %v2355_v20 = vld [vmem:[#allocation4 + $0x94] ss:$8 sps:$4 sm:$0xff]   ;;  %v2353_v23 = vld [vmem:[#allocation4 + $0x90] ss:$8 sps:$4 sm:$0xff]  }
 0x111   :  { %v2358_v24 = vld [vmem:[#allocation4 + $0xa4] ss:$8 sps:$4 sm:$0xff]  }
 0x112   :  { %v249_v29 = vpack.c.bf16 %v246_v26, %v246_v26  ;;  %v2310_v26 = vld [vmem:[#allocation2 + $0x150] ss:$20 sps:$4 sm:$0xff]  }
 0x113   :  { %915 = vmatpush1.bf16.msra.mxu0 %v2257_v25  ;;  %v2307_v25 = vld [vmem:[#allocation2 + $0x260] ss:$20 sps:$4 sm:$0xff]  }
 0x114   :  { %2009 = vmatmul.mubr.msk.bf16.vlgmr.msra.gmra.mrb[8].mxu1 %vm826_vm4, %v249_v29  ;;  %916 = vmatprep.subr.bf16.mxu0 %v2265_v27  ;;  %v2356_v27 = vld [vmem:[#allocation4 + $0xa0] ss:$8 sps:$4 sm:$0xff]  }
 0x115   :  { %954 = vmatpush1.bf16.msra.mxu1 %v2260_v28  ;;  %985 = vmatprep.mubr.bf16.mxu1 %v2506_v0  ;;  %v2361_v28 = vld [vmem:[#allocation4 + $0xb4] ss:$8 sps:$4 sm:$0xff]  }
 0x116   :  { %955 = vmatprep.subr.bf16.mxu1 %v2268_v30  ;;  %v2312_v30 = vld [vmem:[#allocation2 + $0x178] ss:$20 sps:$4 sm:$0xff]  }
 0x117   :  { %917 = vmatpush1.bf16.msra.mxu0 %v2263_v31  ;;  %v2359_v31 = vld [vmem:[#allocation4 + $0xb0] ss:$8 sps:$4 sm:$0xff]  }
 0x118   :  { %918 = vmatprep.subr.bf16.mxu0 %v2271_v32  ;;  %v2313_v32 = vld [vmem:[#allocation2 + $0x38] ss:$20 sps:$4 sm:$0xff]  }
 0x119   :  { %956 = vmatpush1.bf16.msra.mxu1 %v2266_v33  ;;  %v2314_v33 = vld [vmem:[#allocation2 + $0x1a0] ss:$20 sps:$4 sm:$0xff]  }
 0x11a   :  { %2160 = vmatprep.subr.bf16.mxu1 %v2508_v17 }
 0x11b   :  { %919 = vmatpush1.bf16.msra.mxu0 %v2269_v34  ;;  %v2315_v34 = vld [vmem:[#allocation2 + $0x60] ss:$20 sps:$4 sm:$0xff]  }
 0x11c   :  { %2010 = vmatmul.mubr.msk.bf16.vlgmr.msra.gmra.mrb[12].mxu1 %vm826_vm4, %v249_v29  ;;  %920 = vmatprep.subr.bf16.mxu0 %v2274_v35  ;;  %v2316_v35 = vld [vmem:[#allocation2 + $0x1c8] ss:$20 sps:$4 sm:$0xff]  }
 0x11d   :  { %2161 = vmatpush3.bf16.msra.mxu1 %v2275_v36  ;;  %2164 = vmatprep.mubr.msk.bf16.mxu1 %vm2509_vm3, %v2508_v17  ;;  %v2317_v36 = vld [vmem:[#allocation2 + $0x88] ss:$20 sps:$4 sm:$0xff]  }
 0x11e   :  { %2162 = vmatprep.subr.bf16.mxu1 %v2508_v17  ;;  %v2283_v17 = vld [vmem:[#allocation2 + $0x120] ss:$20 sps:$4 sm:$0xff]  }
 0x11f   :  { %921 = vmatpush1.bf16.msra.mxu0 %v2272_v37  ;;  %v2318_v37 = vld [vmem:[#allocation2 + $0x1f0] ss:$20 sps:$4 sm:$0xff]  }
 0x120   :  { %922 = vmatprep.subr.bf16.mxu0 %v2278_v38  ;;  %v2319_v38 = vld [vmem:[#allocation2 + $0xb0] ss:$20 sps:$4 sm:$0xff]  }
 0x121   :  { %2163 = vmatpush3.bf16.msra.mxu1 %v2279_v39  ;;  %v2320_v39 = vld [vmem:[#allocation2 + $0x218] ss:$20 sps:$4 sm:$0xff]  }
 0x122   :  { %1596 = vmatprep.subr.bf16.mxu1 %v2328_v40  ;;  %v2321_v40 = vld [vmem:[#allocation2 + $0xd8] ss:$20 sps:$4 sm:$0xff]  }
 0x123   :  { %923 = vmatpush1.bf16.msra.mxu0 %v2276_v41  ;;  %v2364_v41 = vld [vmem:[#allocation4 + $0xc4] ss:$8 sps:$4 sm:$0xff]  }
 0x124   :  { %2165 = vmatmul.mubr.msk.bf16.vlgmr.msra.gmra.mrb[16].mxu1 %vm826_vm4, %v249_v29  ;;  %924 = vmatprep.subr.bf16.mxu0 %v2282_v42  ;;  %v2311_v29 = vld [vmem:[#allocation2 + $0x10] ss:$20 sps:$4 sm:$0xff]   ;;  %v2323_v42 = vld [vmem:[#allocation2 + $0x100] ss:$20 sps:$4 sm:$0xff]  }
 0x125   :  { %1597 = vmatpush1.bf16.msra.mxu1 %v2326_v43  ;;  %v2362_v43 = vld [vmem:[#allocation4 + $0xc0] ss:$8 sps:$4 sm:$0xff]  }
 0x126   :  { %1598 = vmatprep.subr.bf16.mxu1 %v2331_v44  ;;  %v2324_v44 = vld [vmem:[#allocation2 + $0x268] ss:$20 sps:$4 sm:$0xff]  }
 0x127   :  { %925 = vmatpush1.bf16.msra.mxu0 %v2280_v45  ;;  %v2367_v45 = vld [vmem:[#allocation4 + $0xd4] ss:$8 sps:$4 sm:$0xff]  }
 0x128   :  { %926 = vmatprep.subr.bf16.mxu0 %v2285_v46  ;;  %v2325_v46 = vld [vmem:[#allocation2 + $0x128] ss:$20 sps:$4 sm:$0xff]  }
 0x129   :  { %1599 = vmatpush1.bf16.msra.mxu1 %v2329_v47  ;;  %v2365_v47 = vld [vmem:[#allocation4 + $0xd0] ss:$8 sps:$4 sm:$0xff]  }
 0x12a   :  { %1600 = vmatprep.subr.bf16.mxu1 %v2334_v48  ;;  %v2370_v48 = vld [vmem:[#allocation4 + $0xe4] ss:$8 sps:$4 sm:$0xff]  }
 0x12b   :  { %927 = vmatpush1.bf16.msra.mxu0 %v2283_v17  ;;  %v2368_v17 = vld [vmem:[#allocation4 + $0xe0] ss:$8 sps:$4 sm:$0xff]  }
 0x12c   :  { %928 = vmatprep.subr.bf16.mxu0 %v2288_v49  ;;  %v2373_v49 = vld [vmem:[#allocation4 + $0xf4] ss:$8 sps:$4 sm:$0xff]  }
 0x12d   :  { %1601 = vmatpush1.bf16.msra.mxu1 %v2332_v50  ;;  %v2371_v50 = vld [vmem:[#allocation4 + $0xf0] ss:$8 sps:$4 sm:$0xff]  }
 0x12e   :  { %1602 = vmatprep.subr.bf16.mxu1 %v2337_v51  ;;  %v2376_v51 = vld [vmem:[#allocation4 + $0x104] ss:$8 sps:$4 sm:$0xff]  }
 0x12f   :  { %929 = vmatpush1.bf16.msra.mxu0 %v2286_v52  ;;  %v2434_v52 = vld [vmem:[%s2772_s9 + $0x40] sm:$0xff]  }
 0x130   :  { %930 = vmatprep.subr.bf16.mxu0 %v2291_v53  ;;  %v2435_v53 = vld [vmem:[%s2772_s9] sm:$0xff]  }
 0x131   :  { %1603 = vmatpush1.bf16.msra.mxu1 %v2335_v57  ;;  %v2436_v57 = vld [vmem:[%s2772_s9 + $0x48] sm:$0xff]  }
 0x132   :  { %1604 = vmatprep.subr.bf16.mxu1 %v2340_v59  ;;  %v2438_v59 = vld [vmem:[%s2772_s9 + $0x50] sm:$0xff]  }
 0x133   :  { %931 = vmatpush1.bf16.msra.mxu0 %v2289_v60  ;;  %v2439_v60 = vld [vmem:[%s2772_s9 + $0x10] sm:$0xff]  }
 0x134   :  { %932 = vmatprep.subr.bf16.mxu0 %v2294_v61  ;;  %v2440_v61 = vld [vmem:[%s2772_s9 + $0x58] sm:$0xff]  }
 0x135   :  { %1605 = vmatpush1.bf16.msra.mxu1 %v2338_v62  ;;  %v2441_v62 = vld [vmem:[%s2772_s9 + $0x18] sm:$0xff]  }
 0x136   :  { %1606 = vmatprep.subr.bf16.mxu1 %v2343_v63  ;;  %v2442_v63 = vld [vmem:[%s2772_s9 + $0x60] sm:$0xff]  }
 0x137   :  { %933 = vmatpush1.bf16.msra.mxu0 %v2292_v1  ;;  %v2443_v1 = vld [vmem:[%s2772_s9 + $0x20] sm:$0xff]  }
 0x138   :  { %934 = vmatprep.subr.bf16.mxu0 %v2297_v2  ;;  %v2444_v2 = vld [vmem:[%s2772_s9 + $0x68] sm:$0xff]  }
 0x139   :  { %1607 = vmatpush1.bf16.msra.mxu1 %v2341_v3 }
 0x13a   :  { %1608 = vmatprep.subr.bf16.mxu1 %v2346_v5 }
 0x13b   :  { %935 = vmatpush1.bf16.msra.mxu0 %v2295_v6  ;;  %v2445_v6 = vld [vmem:[%s2772_s9 + $0x28] sm:$0xff]  }
 0x13c   :  { %936 = vmatprep.subr.bf16.mxu0 %v2300_v7 }
 0x13d   :  { %1609 = vmatpush1.bf16.msra.mxu1 %v2344_v8  ;;  %v2704_v8 = vld [vmem:[%s2768_s5] sm:$0x1f] }
 0x13e   :  { %1610 = vmatprep.subr.bf16.mxu1 %v2349_v9 }
 0x13f   :  { %937 = vmatpush1.bf16.msra.mxu0 %v2298_v10  ;;  %v2709_v10 = vld [vmem:[%s2769_s6] sm:$0x1f] }
 0x140   :  { %938 = vmatprep.subr.bf16.mxu0 %v2303_v11  ;;  %v1079_v11 = vrot.slane %v2704_v8, %v2627_v56 }
 0x141   :  { %1611 = vmatpush1.bf16.msra.mxu1 %v2347_v12 }
 0x142   :  { %1612 = vmatprep.subr.bf16.mxu1 %v2352_v13  ;;  %v1083_v13 = vrot.slane %v2704_v8, %v2633_v58 }
 0x143   :  { %939 = vmatpush1.bf16.msra.mxu0 %v2301_v15 }
 0x144   :  { %940 = vmatprep.subr.bf16.mxu0 %v2306_v16  ;;  %v1111_v16 = vrot.slane %v2709_v10, %v2627_v56 }
 0x145   :  { %1613 = vmatpush1.bf16.msra.mxu1 %v2350_v19 }
 0x146   :  { %1614 = vmatprep.subr.bf16.mxu1 %v2355_v20 }
 0x147   :  { %941 = vmatpush1.bf16.msra.mxu0 %v2304_v21  ;;  %v1115_v21 = vrot.slane %v2709_v10, %v2633_v58 }
 0x148   :  { %942 = vmatprep.subr.bf16.mxu0 %v2309_v22 }
 0x149   :  { %1615 = vmatpush1.bf16.msra.mxu1 %v2353_v23 }
 0x14a   :  { %1616 = vmatprep.subr.bf16.mxu1 %v2358_v24 }
 0x14b   :  { %943 = vmatpush1.bf16.msra.mxu0 %v2307_v25 }
 0x14c   :  { %2105 = vmatprep.subr.bf16.mxu0 %v2310_v26 }
 0x14d   :  { %1617 = vmatpush1.bf16.msra.mxu1 %v2356_v27 }
 0x14e   :  { %945 = vmatmul.mubr.bf16.vlgmr.msra.gmra.mrb[4].mxu0 %v2649_v18  ;;  %1618 = vmatprep.subr.bf16.mxu1 %v2361_v28 }
 0x14f   :  { %2106 = vmatpush3.bf16.msra.mxu0 %v2311_v29  ;;  %1026 = vmatprep.mubr.bf16.mxu0 %v2647_v14  ;;  %v2322_v14 = vld [vmem:[#allocation2 + $0x240] ss:$20 sps:$4 sm:$0xff]  }
 0x150   :  { %2107 = vmatprep.subr.bf16.mxu0 %v2312_v30 }
 0x151   :  { %1619 = vmatpush1.bf16.msra.mxu1 %v2359_v31 }
 0x152   :  { %1620 = vmatprep.subr.bf16.mxu1 %v2364_v41 }
 0x153   :  { %2108 = vmatpush3.bf16.msra.mxu0 %v2313_v32 }
 0x154   :  { %2109 = vmatprep.subr.bf16.mxu0 %v2314_v33 }
 0x155   :  { %1621 = vmatpush1.bf16.msra.mxu1 %v2362_v43 }
 0x156   :  { %1622 = vmatprep.subr.bf16.mxu1 %v2367_v45  ;;  %v2383_v45 = vld [vmem:[#allocation4 + $0x130] ss:$8 sps:$4 sm:$0xff]  }
 0x157   :  { %2110 = vmatpush3.bf16.msra.mxu0 %v2315_v34  ;;  %v2374_v34 = vld [vmem:[#allocation4 + $0x100] ss:$8 sps:$4 sm:$0xff]  }
 0x158   :  { %2111 = vmatprep.subr.bf16.mxu0 %v2316_v35 }
 0x159   :  { %1623 = vmatpush1.bf16.msra.mxu1 %v2365_v47  ;;  %v2386_v47 = vld [vmem:[#allocation4 + $0x140] ss:$8 sps:$4 sm:$0xff]  }
 0x15a   :  { %1624 = vmatprep.subr.bf16.mxu1 %v2370_v48  ;;  %v2391_v48 = vld [vmem:[#allocation4 + $0x154] ss:$8 sps:$4 sm:$0xff]  }
 0x15b   :  { %2112 = vmatpush3.bf16.msra.mxu0 %v2317_v36 }
 0x15c   :  { %2113 = vmatprep.subr.bf16.mxu0 %v2318_v37  ;;  %v2379_v37 = vld [vmem:[#allocation4 + $0x114] ss:$8 sps:$4 sm:$0xff]  }
 0x15d   :  { %1625 = vmatpush1.bf16.msra.mxu1 %v2368_v17  ;;  %v2389_v17 = vld [vmem:[#allocation4 + $0x150] ss:$8 sps:$4 sm:$0xff]  }
 0x15e   :  { %1626 = vmatprep.subr.bf16.mxu1 %v2373_v49  ;;  %v2394_v49 = vld [vmem:[#allocation4 + $0x164] ss:$8 sps:$4 sm:$0xff]  }
 0x15f   :  { %2114 = vmatpush3.bf16.msra.mxu0 %v2319_v38  ;;  %v2377_v38 = vld [vmem:[#allocation4 + $0x110] ss:$8 sps:$4 sm:$0xff]  }
 0x160   :  { %2115 = vmatprep.subr.bf16.mxu0 %v2320_v39  ;;  %v2382_v39 = vld [vmem:[#allocation4 + $0x124] ss:$8 sps:$4 sm:$0xff]  }
 0x161   :  { %1627 = vmatpush1.bf16.msra.mxu1 %v2371_v50  ;;  %v2392_v50 = vld [vmem:[#allocation4 + $0x160] ss:$8 sps:$4 sm:$0xff]  }
 0x162   :  { %1637 = vmatprep.subr.bf16.mxu1 %v2376_v51  ;;  %v2397_v51 = vld [vmem:[#allocation4 + $0x174] ss:$8 sps:$4 sm:$0xff]  }
 0x163   :  { %2116 = vmatpush3.bf16.msra.mxu0 %v2321_v40 }
 0x164   :  { %2117 = vmatprep.subr.bf16.mxu0 %v2322_v14 }
 0x167   :  { %2118 = vmatpush3.bf16.msra.mxu0 %v2323_v42  ;;  %v2380_v42 = vld [vmem:[#allocation4 + $0x120] ss:$8 sps:$4 sm:$0xff]  }
 0x168   :  { %2119 = vmatprep.subr.bf16.mxu0 %v2324_v44  ;;  %v2385_v44 = vld [vmem:[#allocation4 + $0x134] ss:$8 sps:$4 sm:$0xff]  }
 0x16b   :  { %2120 = vmatpush3.bf16.msra.mxu0 %v2325_v46  ;;  %v2388_v46 = vld [vmem:[#allocation4 + $0x144] ss:$8 sps:$4 sm:$0xff]  }
 0x16c   :  { %2130 = vmatprep.subr.bf16.mxu0 %v2434_v52  ;;  %v2395_v52 = vld [vmem:[#allocation4 + $0x170] ss:$8 sps:$4 sm:$0xff]  }
 0x16e   :  { %1027 = vmatmul.mubr.bf16.vlgmr.msra.gmra.mrb[8].mxu0 %v2649_v18  ;;  %v2437_v18 = vld [vmem:[%s2772_s9 + $0x8] sm:$0xff]  }
 0x16f   :  { %2131 = vmatpush3.bf16.msra.mxu0 %v2435_v53  ;;  %v2400_v53 = vld [vmem:[#allocation4 + $0x184] ss:$8 sps:$4 sm:$0xff]  }
 0x170   :  { %2132 = vmatprep.subr.bf16.mxu0 %v2436_v57  ;;  %v2398_v57 = vld [vmem:[#allocation4 + $0x180] ss:$8 sps:$4 sm:$0xff]  }
 0x173   :  { %2133 = vmatpush3.bf16.msra.mxu0 %v2437_v18  ;;  %v2403_v18 = vld [vmem:[#allocation4 + $0x194] ss:$8 sps:$4 sm:$0xff]  }
 0x174   :  { %2134 = vmatprep.subr.bf16.mxu0 %v2438_v59  ;;  %v2401_v59 = vld [vmem:[#allocation4 + $0x190] ss:$8 sps:$4 sm:$0xff]  }
 0x177   :  { %2135 = vmatpush3.bf16.msra.mxu0 %v2439_v60  ;;  %v2406_v60 = vld [vmem:[#allocation4 + $0x1a4] ss:$8 sps:$4 sm:$0xff]  }
 0x178   :  { %2136 = vmatprep.subr.bf16.mxu0 %v2440_v61  ;;  %v2404_v61 = vld [vmem:[#allocation4 + $0x1a0] ss:$8 sps:$4 sm:$0xff]  }
 0x17b   :  { %2137 = vmatpush3.bf16.msra.mxu0 %v2441_v62  ;;  %v2409_v62 = vld [vmem:[#allocation4 + $0x1b4] ss:$8 sps:$4 sm:$0xff]  }
 0x17c   :  { %2138 = vmatprep.subr.bf16.mxu0 %v2442_v63  ;;  %v2407_v63 = vld [vmem:[#allocation4 + $0x1b0] ss:$8 sps:$4 sm:$0xff]  }
 0x17f   :  { %2139 = vmatpush3.bf16.msra.mxu0 %v2443_v1  ;;  %v1090_v1 = vsub.s32 3, %v2624_v55 }
 0x180   :  { %2140 = vmatprep.subr.bf16.mxu0 %v2444_v2  ;;  %v2412_v2 = vld [vmem:[#allocation4 + $0x1c4] ss:$8 sps:$4 sm:$0xff]  }
 0x183   :  { %2141 = vmatpush3.bf16.msra.mxu0 %v2445_v6  ;;  %v2410_v6 = vld [vmem:[#allocation4 + $0x1c0] ss:$8 sps:$4 sm:$0xff]  }
 0x1e1   :  { %v864_v3 = vpop.f32.mrb[0].mxu0 }
 0x1e2   :  { %v866_v5 = vpop.f32.mrb[1].mxu0 }
 0x1e3   :  { %v868_v7 = vpop.f32.mrb[2].mxu0 }
 0x1e4   :  { %v869_v9 = vpop.f32.mrb[3].mxu0 }
 0x1e5   :  { %v1087_v9 = vrot.slane %v2704_v8, %v2643_v4 }
 0x1e7   :  { %v905_v12 = vpop.f32.mrb[8].mxu1 }
 0x1e8   :  { %v906_v15 = vadd.f32 %v905_v12, %v864_v3  ;;  %v907_v19 = vpop.f32.mrb[9].mxu1  ;;  %v2415_v12 = vld [vmem:[#allocation4 + $0x1d4] ss:$8 sps:$4 sm:$0xff]  }
 0x1e9   :  { %v908_v20 = vadd.f32 %v907_v19, %v866_v5  ;;  %v909_v22 = vpop.f32.mrb[10].mxu1  ;;  %v1091_v5 = vrot.slane %v2704_v8, %v1090_v1 }
 0x1ea   :  { %v1101_v23 = vmul.f32 %v1079_v11, %v906_v15  ;;  %v910_v24 = vpop.f32.mrb[11].mxu1  ;;  %v1123_v15 = vrot.slane %v2709_v10, %v1090_v1 }
 0x1eb   :  { %v1102_v25 = vmul.f32 %v1083_v13, %v908_v20  ;;  %v2418_v24 = vld [vmem:[#allocation4 + $0x1e4] ss:$8 sps:$4 sm:$0xff]  }
 0x1ec   :  { %v1133_v26 = vadd.f32 %v1111_v16, %v1101_v23  ;;  %v1119_v23 = vrot.slane %v2709_v10, %v2643_v4  ;;  %v2427_v4 = vld [vmem:[#allocation4 + $0x214] ss:$8 sps:$4 sm:$0xff]  }
 0x1ed   :  { %v1134_v27 = vadd.f32 %v1115_v21, %v1102_v25  ;;  %v2413_v21 = vld [vmem:[#allocation4 + $0x1d0] ss:$8 sps:$4 sm:$0xff]  }
 0x1ee   :  { %v1138_v28 = vmax.f32 %v1133_v26, 0.0  ;;  %v2416_v26 = vld [vmem:[#allocation4 + $0x1e0] ss:$8 sps:$4 sm:$0xff]  }
 0x1ef   :  { %v2719_v29 = vpop.f32.mrb[12].mxu1  ;;  %v1139_v30 = vmax.f32 %v1134_v27, 0.0 }
 0x1f0   :  { %v2721_v31 = vpop.f32.mrb[13].mxu1  ;;  %v1143_v35 = vpack.c.bf16 %v1138_v28, %v1138_v28 }
 0x1f1   :  { %v991_v32 = vpop.f32.mrb[14].mxu1  ;;  %v1144_v33 = vpack.c.bf16 %v1139_v30, %v1139_v30 }
 0x1f2   :  { %v992_v36 = vpop.f32.mrb[15].mxu1 }
 0x1f3   :  { %1628 = vmatprep.mubr.bf16.mxu1 %v1144_v33  ;;  %v2424_v33 = vld [vmem:[#allocation4 + $0x204] ss:$8 sps:$4 sm:$0xff]   ;;  %v2425_v36 = vld [vmem:[#allocation4 + $0x210] ss:$8 sps:$4 sm:$0xff]  }
 0x1f4   :  { %1629 = vmatmul.mubr.bf16.vlgmr.msra.gmra.mrb[20].mxu1 %v1143_v35 }
 0x1f5   :  { %1638 = vmatpush1.bf16.msra.mxu1 %v2374_v34  ;;  %v2422_v34 = vld [vmem:[#allocation4 + $0x200] ss:$8 sps:$4 sm:$0xff]  }
 0x1f6   :  { %1639 = vmatprep.subr.bf16.mxu1 %v2379_v37  ;;  %v2430_v37 = vld [vmem:[#allocation4 + $0x224] ss:$8 sps:$4 sm:$0xff]  }
 0x1f7   :  { %v2723_v40 = vpop.f32.mrb[16].mxu1 }
 0x1f8   :  { %v2166_v14 = vpop.f32.mrb[17].mxu1 }
 0x1f9   :  { %1640 = vmatpush1.bf16.msra.mxu1 %v2377_v38  ;;  %v1071_v41 = vpop.f32.mrb[18].mxu1  ;;  %v2428_v38 = vld [vmem:[#allocation4 + $0x220] ss:$8 sps:$4 sm:$0xff]   ;;  %v2431_v14 = vld [vmem:[#allocation4 + $0x230] ss:$8 sps:$4 sm:$0xff]  }
 0x1fa   :  { %v2167_v43 = vpop.f32.mrb[19].mxu1  ;;  %1641 = vmatprep.subr.bf16.mxu1 %v2382_v39  ;;  %v2433_v39 = vld [vmem:[#allocation4 + $0x234] ss:$8 sps:$4 sm:$0xff]   ;;  %v1094_v41 = vsub.s32 4, %v2624_v55  ;;  %v2446_v55 = vld [vmem:[%s2772_s9 + $0x70] sm:$0xff]  }
 0x1fb   :  { %2142 = vmatprep.subr.bf16.mxu0 %v2446_v55 }
 0x1fd   :  { %1642 = vmatpush1.bf16.msra.mxu1 %v2380_v42 }
 0x1fe   :  { %1643 = vmatprep.subr.bf16.mxu1 %v2385_v44 }
 0x201   :  { %1644 = vmatpush1.bf16.msra.mxu1 %v2383_v45  ;;  %v1095_v45 = vrot.slane %v2704_v8, %v1094_v41  ;;  %v2447_v8 = vld [vmem:[%s2772_s9 + $0x30] sm:$0xff]  }
 0x202   :  { %1645 = vmatprep.subr.bf16.mxu1 %v2388_v46  ;;  %2143 = vmatpush3.bf16.msra.mxu0 %v2447_v8 }
 0x205   :  { %1646 = vmatpush1.bf16.msra.mxu1 %v2386_v47 }
 0x206   :  { %1647 = vmatprep.subr.bf16.mxu1 %v2391_v48  ;;  %v1127_v48 = vrot.slane %v2709_v10, %v1094_v41  ;;  %v2448_v10 = vld [vmem:[%s2772_s9 + $0x78] sm:$0xff]  }
 0x207   :  { %2144 = vmatprep.subr.bf16.mxu0 %v2448_v10 }
 0x209   :  { %1648 = vmatpush1.bf16.msra.mxu1 %v2389_v17 }
 0x20a   :  { %1649 = vmatprep.subr.bf16.mxu1 %v2394_v49 }
 0x20d   :  { %1650 = vmatpush1.bf16.msra.mxu1 %v2392_v50 }
 0x20e   :  { %1651 = vmatprep.subr.bf16.mxu1 %v2397_v51 }
 0x211   :  { %1652 = vmatpush1.bf16.msra.mxu1 %v2395_v52  ;;  %v1220_v52 = vld [vmem:[%s2771_s8] sm:$0x3] }
 0x212   :  { %1653 = vmatprep.subr.bf16.mxu1 %v2400_v53  ;;  %v1225_v53 = vrot.slane %v1220_v52, %v2627_v56 }
 0x215   :  { %1654 = vmatpush1.bf16.msra.mxu1 %v2398_v57  ;;  %v1229_v57 = vrot.slane %v1220_v52, %v2633_v58 }
 0x216   :  { %1655 = vmatprep.subr.bf16.mxu1 %v2403_v18 }
 0x219   :  { %1656 = vmatpush1.bf16.msra.mxu1 %v2401_v59 }
 0x21a   :  { %1657 = vmatprep.subr.bf16.mxu1 %v2406_v60 }
 0x21d   :  { %1658 = vmatpush1.bf16.msra.mxu1 %v2404_v61 }
 0x21e   :  { %1659 = vmatprep.subr.bf16.mxu1 %v2409_v62 }
 0x221   :  { %v946_v3 = vpop.f32.mrb[4].mxu0  ;;  %1660 = vmatpush1.bf16.msra.mxu1 %v2407_v63 }
 0x222   :  { %v988_v7 = vadd.f32 %v2719_v29, %v946_v3  ;;  %v948_v11 = vpop.f32.mrb[5].mxu0  ;;  %1661 = vmatprep.subr.bf16.mxu1 %v2412_v2  ;;  %v2421_v29 = vld [vmem:[#allocation4 + $0x1f4] ss:$8 sps:$4 sm:$0xff]  }
 0x223   :  { %v990_v13 = vadd.f32 %v2721_v31, %v948_v11  ;;  %v950_v16 = vpop.f32.mrb[6].mxu0  ;;  %v2419_v31 = vld [vmem:[#allocation4 + $0x1f0] ss:$8 sps:$4 sm:$0xff]  }
 0x224   :  { %v951_v19 = vpop.f32.mrb[7].mxu0  ;;  %v1103_v22 = vmul.f32 %v1087_v9, %v988_v7  ;;  %v2085_v7 = vld [vmem:[%s2773_s10] ss:$0 sm:$0xff] }
 0x225   :  { %v1104_v20 = vmul.f32 %v1091_v5, %v990_v13  ;;  %1662 = vmatpush1.bf16.msra.mxu1 %v2410_v6  ;;  %v1899_v13 = vand.u32 127, %v206_v54 }
 0x226   :  { %1663 = vmatprep.subr.bf16.mxu1 %v2415_v12  ;;  %v1135_v28 = vadd.f32 %v1119_v23, %v1103_v22 }
 0x227   :  { %v1136_v25 = vadd.f32 %v1123_v15, %v1104_v20  ;;  %vm1900_vm6 = vcmp.eq.s32.totalorder %v1899_v13, 9 }
 0x228   :  { %v1140_v32 = vmax.f32 %v1135_v28, 0.0 }
 0x229   :  { %1664 = vmatpush1.bf16.msra.mxu1 %v2413_v21  ;;  %v1141_v27 = vmax.f32 %v1136_v25, 0.0 }
 0x22a   :  { %1665 = vmatprep.subr.bf16.mxu1 %v2418_v24  ;;  %v1145_v35 = vpack.c.bf16 %v1140_v32, %v1140_v32 }
 0x22b   :  { %v1146_v30 = vpack.c.bf16 %v1141_v27, %v1141_v27 }
 0x22d   :  { %1666 = vmatpush1.bf16.msra.mxu1 %v2416_v26  ;;  %1669 = vmatprep.mubr.bf16.mxu1 %v1146_v30 }
 0x22e   :  { %1667 = vmatprep.subr.bf16.mxu1 %v2421_v29 }
 0x231   :  { %1668 = vmatpush1.bf16.msra.mxu1 %v2419_v31 }
 0x232   :  { %1678 = vmatprep.subr.bf16.mxu1 %v2424_v33 }
 0x234   :  { %1670 = vmatmul.mubr.bf16.vlgmr.msra.gmra.mrb[20].mxu1 %v1145_v35 }
 0x235   :  { %1679 = vmatpush1.bf16.msra.mxu1 %v2422_v34  ;;  %1710 = vmatprep.mubr.bf16.mxu1 %v2506_v0 }
 0x236   :  { %1680 = vmatprep.subr.bf16.mxu1 %v2427_v4 }
 0x239   :  { %1681 = vmatpush1.bf16.msra.mxu1 %v2425_v36 }
 0x23a   :  { %1682 = vmatprep.subr.bf16.mxu1 %v2430_v37 }
 0x23d   :  { %1683 = vmatpush1.bf16.msra.mxu1 %v2428_v38 }
 0x23e   :  { %1684 = vmatprep.subr.bf16.mxu1 %v2433_v39 }
 0x241   :  { %v2121_v42 = vpop.f32.mrb[8].mxu0  ;;  %1685 = vmatpush1.bf16.msra.mxu1 %v2431_v14 }
 0x242   :  { %v2122_v43 = vpop.f32.mrb[9].mxu0 }
 0x243   :  { %v2123_v44 = vadd.f32 %v2122_v43, %v2121_v42  ;;  %v2124_v46 = vpop.f32.mrb[10].mxu0 }
 0x244   :  { %v2125_v47 = vpop.f32.mrb[11].mxu0 }
 0x245   :  { %v1069_v0 = vadd.f32 %v2123_v44, %v2723_v40  ;;  %v2449_v40 = vld [vmem:[%s2772_s9 + $0x38] sm:$0xff]  }
 0x246   :  { %2145 = vmatpush3.bf16.msra.mxu0 %v2449_v40 }
 0x247   :  { %v1105_v17 = vmul.f32 %v1095_v45, %v1069_v0 }
 0x249   :  { %v1137_v49 = vadd.f32 %v1127_v48, %v1105_v17 }
 0x24b   :  { %v1142_v50 = vmax.f32 %v1137_v49, 0.0 }
 0x24d   :  { %v1147_v51 = vpack.c.bf16 %v1142_v50, %v1142_v50 }
 0x24f   :  { %2084 = vmatmul.mubr.msk.bf16.vlgmr.msra.gmra.mrb[20].mxu1 %vm1592_vm5, %v1147_v51 }
 0x322   :  { %v1712_v18 = vpop.f32.mrb[20].mxu1 }
 0x323   :  { %v2172_v59 = vadd.f32 %v1712_v18, %v1225_v53  ;;  %v1714_v60 = vpop.f32.mrb[21].mxu1 }
 0x324   :  { %v2173_v61 = vadd.f32 %v1714_v60, %v1229_v57  ;;  %v1716_v62 = vpop.f32.mrb[22].mxu1 }
 0x325   :  { %v1719_v63 = vmax.f32 %v2172_v59, 0.0  ;;  %v1717_v1 = vpop.f32.mrb[23].mxu1 }
 0x326   :  { %v1720_v2 = vmax.f32 %v2173_v61, 0.0 }
 0x327   :  { %v1721_v5 = vpack.c.bf16 %v1719_v63, %v1719_v63 }
 0x328   :  { %v1722_v3 = vpack.c.bf16 %v1720_v2, %v1720_v2 }
 0x32a   :  { %1890 = vmatprep.mubr.bf16.mxu0 %v1722_v3 }
 0x32b   :  { %1891 = vmatmul.mubr.bf16.vlgmr.msra.gmra.mrb[12].mxu0 %v1721_v5 }
 0x3fe   :  { %v2146_v6 = vpop.f32.mrb[12].mxu0 }
 0x3ff   :  { %v2147_v56 = vpop.f32.mrb[13].mxu0 }
 0x400   :  { %v2148_v9 = vadd.f32 %v2147_v56, %v2146_v6  ;;  %v2149_v58 = vpop.f32.mrb[14].mxu0 }
 0x401   :  { %v2150_v11 = vpop.f32.mrb[15].mxu0 }
 0x402   :  { %v1893_v12 = vadd.f32 %v2148_v9, %v2085_v7 }
 0x404   :  { %2450 = vtanh.f32 %v1893_v12 }
 0x40e   :  { %v2451_v15 = vpop.eup %2450 }
 0x40f   :  { %v1902_v16 = vsel %vm1900_vm6, %v2451_v15, %v1893_v12 }
 0x410   :  { %1904 = vst.msk [vmem:[%s2774_s11] sm:$0xff] %vm1903_vm7, %v1902_v16 }
 0x411   :  { %1909 = vsyncpa [#allocation3], 1 }
 0x412   :  { %1910 = vsyncpa [#allocation5], 1 }

</bundles_post_ra>
